<compile_context>
chip_gen: v7x
topology: tpu7x:2x2x1
jax: 0.10.0
libtpu: 0.0.40
codegen_flags: <defaults>
</compile_context>

<pallas_src>
import functools

import jax
import jax.numpy as jnp
from jax.experimental import pallas as pl
from jax.experimental.pallas import tpu as pltpu

_LANE = 128
_SUBLANE = 8
_NEG_SLOPE = 0.01  # PyTorch LeakyReLU default


def _round_up(x, m):
    return ((x + m - 1) // m) * m


def _mlp_kernel(x_ref, w1_ref, b1_ref, w2_ref, b2_ref, o_ref):
    # Linear 1 (BN + bias already folded into w1/b1). bf16 operands, f32 accum.
    # (astype is a no-op if the caller already supplies bf16 x.)
    x = x_ref[...].astype(jnp.bfloat16)
    h = jnp.dot(x, w1_ref[...], preferred_element_type=jnp.float32)
    h = h + b1_ref[...]
    # Dropout: identity in eval mode.
    # LeakyReLU (slope 0.01), f32 elementwise.
    h = jnp.where(h >= 0, h, _NEG_SLOPE * h)
    # Linear 2 + bias.
    o = jnp.dot(h.astype(jnp.bfloat16), w2_ref[...],
                preferred_element_type=jnp.float32)
    o_ref[...] = (o + b2_ref[...]).astype(o_ref.dtype)


@functools.partial(jax.jit, static_argnames=("block_batch",))
def post_process_mlp(x, w1, b1, bn_scale, bn_shift, w2, b2, *,
                     block_batch=1024):
    """x: (N, input_dim) -> (N, output_dim).

    w1: (input_dim, output_dim)  (pre-transposed, i.e. PyTorch W1.T)
    w2: (output_dim, output_dim) (pre-transposed)
    bn_scale/bn_shift: folded eval-mode BatchNorm affine.
    """
    n, input_dim = x.shape
    output_dim = w1.shape[1]

    # --- Host-side folding: BN + b1 into the first linear layer. ---
    w1f = (w1 * bn_scale[None, :]).astype(jnp.bfloat16)   # (in, out)
    b1f = (b1 * bn_scale + bn_shift).astype(jnp.float32)  # (out,)

    # Hidden dim padded to 128 lanes (VMEM-only => free, keeps matmul 2 dense).
    f_pad = _round_up(output_dim, _LANE)

    # --- Batch tile: large, multiple of 8; ragged last block via cdiv grid. ---
    bb = _round_up(min(block_batch, _round_up(n, _SUBLANE)), _SUBLANE)
    grid = (pl.cdiv(n, bb),)

    # --- Pad only the (tiny, one-time) weights/biases. ---
    w1_p = jnp.zeros((input_dim, f_pad), jnp.bfloat16).at[
        :, :output_dim].set(w1f)
    b1_p = jnp.zeros((1, f_pad), jnp.float32).at[0, :output_dim].set(b1f)
    w2_p = jnp.zeros((f_pad, output_dim), jnp.bfloat16).at[
        :output_dim, :].set(w2.astype(jnp.bfloat16))
    b2_r = b2.astype(jnp.float32).reshape(1, output_dim)

    # --- Explicit VMEM budget from actual tiles (+headroom, 64 MiB cap). ---
    x_bytes = jnp.dtype(x.dtype).itemsize
    vmem_bytes = (
        2 * bb * input_dim * x_bytes          # x tiles (double-buffered)
        + 2 * bb * output_dim * 4             # out tiles (double-buffered)
        + 2 * (input_dim * f_pad + f_pad * output_dim) * 2   # bf16 weights
        + 2 * (f_pad + output_dim) * 4        # biases
    )
    vmem_limit = min(int(vmem_bytes * 1.5) + (4 << 20), 64 << 20)

    out = pl.pallas_call(
        _mlp_kernel,
        out_shape=jax.ShapeDtypeStruct((n, output_dim), jnp.float32),
        grid_spec=pltpu.PrefetchScalarGridSpec(
            num_scalar_prefetch=0,
            grid=grid,
            in_specs=[
                pl.BlockSpec((bb, input_dim), lambda i: (i, 0)),       # x tile
                pl.BlockSpec((input_dim, f_pad), lambda i: (0, 0)),    # W1'
                pl.BlockSpec((1, f_pad), lambda i: (0, 0)),            # b1'
                pl.BlockSpec((f_pad, output_dim), lambda i: (0, 0)),   # W2
                pl.BlockSpec((1, output_dim), lambda i: (0, 0)),       # b2
            ],
            out_specs=pl.BlockSpec((bb, output_dim), lambda i: (i, 0)),
        ),
        compiler_params=pltpu.CompilerParams(
            dimension_semantics=("parallel",),
            vmem_limit_bytes=vmem_limit),
    )(x, w1_p, b1_p, w2_p, b2_r)

    return out


def _reference(x, w1, b1, bn_scale, bn_shift, w2, b2):
    h = x @ w1 + b1
    h = h * bn_scale + bn_shift
    h = jnp.where(h >= 0, h, _NEG_SLOPE * h)
    return h @ w2 + b2


def _make_params(key, input_dim, output_dim, eps=1e-5):
    kw1, kb1, kg, kbeta, krm, krv, kw2, kb2 = jax.random.split(key, 8)
    bound1 = 1.0 / (input_dim ** 0.5)
    w1 = jax.random.uniform(kw1, (input_dim, output_dim), jnp.float32,
                            -bound1, bound1)
    b1 = jax.random.uniform(kb1, (output_dim,), jnp.float32, -bound1, bound1)

    gamma = jax.random.uniform(kg, (output_dim,), jnp.float32, 0.5, 1.5)
    beta = jax.random.uniform(kbeta, (output_dim,), jnp.float32, -0.5, 0.5)
    running_mean = jax.random.normal(krm, (output_dim,), jnp.float32) * 0.1
    running_var = jax.random.uniform(krv, (output_dim,), jnp.float32, 0.5, 1.5)

    bound2 = 1.0 / (output_dim ** 0.5)
    w2 = jax.random.uniform(kw2, (output_dim, output_dim), jnp.float32,
                            -bound2, bound2)
    b2 = jax.random.uniform(kb2, (output_dim,), jnp.float32, -bound2, bound2)

    # Fold BatchNorm (eval mode) into a per-feature affine.
    bn_scale = gamma / jnp.sqrt(running_var + eps)
    bn_shift = beta - running_mean * bn_scale
    return w1, b1, bn_scale, bn_shift, w2, b2


if __name__ == "__main__":
    # Shapes consistent with the Encoder: post_mlp is 64 -> 64 per node type.
    input_dim, output_dim = 64, 64
    key = jax.random.PRNGKey(0)
    kp, kx1, kx2 = jax.random.split(key, 3)
    params = _make_params(kp, input_dim, output_dim)

    # Case 1: batch divides the tile exactly (single grid step).
    x1 = jax.random.normal(kx1, (16, input_dim), dtype=jnp.float32)
    out1 = jax.block_until_ready(post_process_mlp(x1, *params))
    ref1 = _reference(x1, *params)
    assert out1.shape == (16, output_dim)
    assert jnp.allclose(out1, ref1, atol=3e-2, rtol=3e-2)

    # Case 2: ragged last block (N=13 not a multiple of the 8-row tile),
    # exercising the cdiv grid + masked out-of-bounds writeback path.
    x2 = jax.random.normal(kx2, (13, input_dim), dtype=jnp.float32)
    out2 = jax.block_until_ready(post_process_mlp(x2, *params, block_batch=8))
    ref2 = _reference(x2, *params)
    assert out2.shape == (13, output_dim)
    assert jnp.allclose(out2, ref2, atol=3e-2, rtol=3e-2)

    print("KERNEL_OK")
</pallas_src>

<mosaic_0001>
module attributes {stable_mosaic.version = 11 : i64} {
  func.func @_mlp_kernel(%arg0: i32, %arg1: memref<16x64xf32, #tpu.memory_space<vmem>>, %arg2: memref<64x128xbf16, #tpu.memory_space<vmem>>, %arg3: memref<1x128xf32, #tpu.memory_space<vmem>>, %arg4: memref<128x64xbf16, #tpu.memory_space<vmem>>, %arg5: memref<1x64xf32, #tpu.memory_space<vmem>>, %arg6: memref<16x64xf32, #tpu.memory_space<vmem>>) attributes {dimension_semantics = [#tpu.dimension_semantics<parallel>], iteration_bounds = array<i64: 1>, scalar_prefetch = 0 : i64, scratch_operands = 0 : i64, tpu.core_type = #tpu.core_type<tc>, window_params = [{transform_indices = @transform_0, window_bounds = array<i64: 16, 64>}, {pipeline_mode = #tpu.pipeline_mode<synchronous>, transform_indices = @transform_1, window_bounds = array<i64: 64, 128>}, {pipeline_mode = #tpu.pipeline_mode<synchronous>, transform_indices = @transform_2, window_bounds = array<i64: 1, 128>}, {pipeline_mode = #tpu.pipeline_mode<synchronous>, transform_indices = @transform_3, window_bounds = array<i64: 128, 64>}, {pipeline_mode = #tpu.pipeline_mode<synchronous>, transform_indices = @transform_4, window_bounds = array<i64: 1, 64>}, {transform_indices = @transform_5, window_bounds = array<i64: 16, 64>}]} {
    %c0 = arith.constant 0 : index
    %c0_0 = arith.constant 0 : index
    %0 = vector.load %arg1[%c0, %c0_0] : memref<16x64xf32, #tpu.memory_space<vmem>>, vector<16x64xf32>
    %1 = arith.truncf %0 : vector<16x64xf32> to vector<16x64xbf16>
    %c0_1 = arith.constant 0 : index
    %c0_2 = arith.constant 0 : index
    %2 = vector.load %arg2[%c0_1, %c0_2] : memref<64x128xbf16, #tpu.memory_space<vmem>>, vector<64x128xbf16>
    %cst = arith.constant dense<0.000000e+00> : vector<16x128xf32>
    %3 = tpu.matmul %1, %2, %cst {dimension_numbers = #tpu.dot_dimension_numbers<[1], [0], [0], [1], [0, 0, 1, 1], [], []>} : vector<16x64xbf16>, vector<64x128xbf16>, vector<16x128xf32> -> vector<16x128xf32>
    %c0_3 = arith.constant 0 : index
    %c0_4 = arith.constant 0 : index
    %4 = vector.load %arg3[%c0_3, %c0_4] : memref<1x128xf32, #tpu.memory_space<vmem>>, vector<1x128xf32>
    %5 = vector.broadcast %4 : vector<1x128xf32> to vector<16x128xf32>
    %6 = arith.addf %3, %5 : vector<16x128xf32>
    %cst_5 = arith.constant 0.000000e+00 : f32
    %7 = vector.broadcast %cst_5 : f32 to vector<16x128xf32>
    %8 = arith.cmpf oge, %6, %7 : vector<16x128xf32>
    %cst_6 = arith.constant 0.00999999977 : f32
    %9 = vector.broadcast %cst_6 : f32 to vector<16x128xf32>
    %10 = arith.mulf %9, %6 : vector<16x128xf32>
    %11 = arith.select %8, %6, %10 : vector<16x128xi1>, vector<16x128xf32>
    %12 = arith.truncf %11 : vector<16x128xf32> to vector<16x128xbf16>
    %c0_7 = arith.constant 0 : index
    %c0_8 = arith.constant 0 : index
    %13 = vector.load %arg4[%c0_7, %c0_8] : memref<128x64xbf16, #tpu.memory_space<vmem>>, vector<128x64xbf16>
    %cst_9 = arith.constant dense<0.000000e+00> : vector<16x64xf32>
    %14 = tpu.matmul %12, %13, %cst_9 {dimension_numbers = #tpu.dot_dimension_numbers<[1], [0], [0], [1], [0, 0, 1, 1], [], []>} : vector<16x128xbf16>, vector<128x64xbf16>, vector<16x64xf32> -> vector<16x64xf32>
    %c0_10 = arith.constant 0 : index
    %c0_11 = arith.constant 0 : index
    %15 = vector.load %arg5[%c0_10, %c0_11] : memref<1x64xf32, #tpu.memory_space<vmem>>, vector<1x64xf32>
    %16 = vector.broadcast %15 : vector<1x64xf32> to vector<16x64xf32>
    %17 = arith.addf %14, %16 : vector<16x64xf32>
    %c0_12 = arith.constant 0 : index
    %c0_13 = arith.constant 0 : index
    %18 = vector.load %arg6[%c0_12, %c0_13] : memref<16x64xf32, #tpu.memory_space<vmem>>, vector<16x64xf32>
    tpu.vector_store %arg6[%c0_12, %c0_13], %17 {strides = array<i32>} : memref<16x64xf32, #tpu.memory_space<vmem>>, vector<16x64xf32>,
    return
  }
  func.func @transform_0(%arg0: i32) -> (i32, i32) {
    %c0_i32 = arith.constant 0 : i32
    %c0_i32_0 = arith.constant 0 : i32
    return %arg0, %c0_i32 : i32, i32
  }
  func.func @transform_1(%arg0: i32) -> (i32, i32) {
    %c0_i32 = arith.constant 0 : i32
    %c0_i32_0 = arith.constant 0 : i32
    %c0_i32_1 = arith.constant 0 : i32
    return %c0_i32, %c0_i32_0 : i32, i32
  }
  func.func @transform_2(%arg0: i32) -> (i32, i32) {
    %c0_i32 = arith.constant 0 : i32
    %c0_i32_0 = arith.constant 0 : i32
    %c0_i32_1 = arith.constant 0 : i32
    return %c0_i32, %c0_i32_0 : i32, i32
  }
  func.func @transform_3(%arg0: i32) -> (i32, i32) {
    %c0_i32 = arith.constant 0 : i32
    %c0_i32_0 = arith.constant 0 : i32
    %c0_i32_1 = arith.constant 0 : i32
    return %c0_i32, %c0_i32_0 : i32, i32
  }
  func.func @transform_4(%arg0: i32) -> (i32, i32) {
    %c0_i32 = arith.constant 0 : i32
    %c0_i32_0 = arith.constant 0 : i32
    %c0_i32_1 = arith.constant 0 : i32
    return %c0_i32, %c0_i32_0 : i32, i32
  }
  func.func @transform_5(%arg0: i32) -> (i32, i32) {
    %c0_i32 = arith.constant 0 : i32
    %c0_i32_0 = arith.constant 0 : i32
    return %arg0, %c0_i32 : i32, i32
  }
}

</mosaic_0001>

<bundles_post_ra>
// kernel: post_process_mlp.1
= control target key start
LH: loop header
LB: loop body
LE: loop exit
PB: predicated region body
PF: predicated region fallthrough
CT: control target
= control target key end

     0   :  { %v348_v1 = vmov 0.0   ;;  %vm349_vm0 = vmmov 0   ;;  %s446_s0 = inlined_call_operand.vmem [shape: f32[16,64], index: 0, kind: input, shape index: {}]   ;;  %s447_s1 = inlined_call_operand.vmem [shape: bf16[64,128], index: 1, kind: input, shape index: {}]   ;;  %s448_s2 = inlined_call_operand.vmem [shape: f32[1,128], index: 2, kind: input, shape index: {}]   ;;  %s449_s3 = inlined_call_operand.vmem [shape: bf16[128,64], index: 3, kind: input, shape index: {}]   ;;  %s450_s4 = inlined_call_operand.vmem [shape: f32[1,64], index: 4, kind: input, shape index: {}]   ;;  %s451_s5 = inlined_call_operand.hbm [shape: f32[16,64], index: 5, kind: output, shape index: {}]  }
   0x1   :  { %v312_v0 = vld [vmem:[%s447_s1] sm:$0xff]   ;;  %275 = vmatprep.subr.bf16.mxu0 %v348_v1  ;;  %287 = vmatprep.subr.bf16.mxu1 %v348_v1  ;;  %v313_v2 = vld [vmem:[%s447_s1 + $0x8] sm:$0xff]   ;;  %v314_v4 = vld [vmem:[%s447_s1 + $0x10] sm:$0xff]  }
   0x2   :  { %276 = vmatpush3.bf16.msra.mxu0 %v312_v0  ;;  %283 = vmatprep.mubr.msk.bf16.mxu0 %vm349_vm0, %v348_v1  ;;  %v316_v3 = vld [vmem:[%s449_s3] sm:$0xff]   ;;  %v317_v5 = vld [vmem:[%s449_s3 + $0x8] sm:$0xff]   ;;  %v315_v6 = vld [vmem:[%s447_s1 + $0x18] sm:$0xff]  }
   0x3   :  { %277 = vmatprep.subr.bf16.mxu0 %v348_v1  ;;  %303 = vmatprep.mubr.msk.bf16.mxu1 %vm349_vm0, %v348_v1  ;;  %v22_v7 = vld [vmem:[%s446_s0] sm:$0xff]  ;;  %v23_v8 = vld [vmem:[%s446_s0 + $0x8] sm:$0xff]  ;;  %v318_v9 = vld [vmem:[%s449_s3 + $0x10] sm:$0xff]  }
   0x4   :  { %288 = vmatpush3.bf16.msra.mxu1 %v316_v3 }
   0x5   :  { %289 = vmatprep.subr.bf16.mxu1 %v348_v1 }
   0x6   :  { %278 = vmatpush3.bf16.msra.mxu0 %v313_v2 }
   0x7   :  { %279 = vmatprep.subr.bf16.mxu0 %v348_v1 }
   0x8   :  { %290 = vmatpush3.bf16.msra.mxu1 %v317_v5 }
   0x9   :  { %291 = vmatprep.subr.bf16.mxu1 %v348_v1 }
   0xa   :  { %280 = vmatpush3.bf16.msra.mxu0 %v314_v4 }
   0xb   :  { %281 = vmatprep.subr.bf16.mxu0 %v348_v1 }
   0xc   :  { %10 = vsyncpa [#allocation3], 0  ;;  %v24_v10 = vpack.c.bf16 %v23_v8, %v22_v7  ;;  %vm64_vm1 = vcmask 523264   ;;  %292 = vmatpush3.bf16.msra.mxu1 %v318_v9  ;;  %v319_v11 = vld [vmem:[%s449_s3 + $0x18] sm:$0xff]   ;;  %v320_v12 = vld [vmem:[%s449_s3 + $0x20] sm:$0xff]   ;;  %s350_s22 = smov [#allocation2]  }
   0xd   :  { %293 = vmatprep.subr.bf16.mxu1 %v348_v1  ;;  %v321_v13 = vld [vmem:[%s449_s3 + $0x28] sm:$0xff]   ;;  %v322_v14 = vld [vmem:[%s449_s3 + $0x30] sm:$0xff]   ;;  %v323_v15 = vld [vmem:[%s449_s3 + $0x38] sm:$0xff]  }
   0xe   :  { %282 = vmatpush3.bf16.msra.mxu0 %v315_v6  ;;  %v246_v16 = vld [vmem:[%s448_s2] ss:$0 sm:$0xff]  ;;  %s235_s2 = sshll.u32 %s350_s22, 4  ;;  %s236_s2 = int_to_ptr.vmem [resolvable:$true] %s235_s2 }
   0xf   :  { %v252_v28 = vld [vmem:[%s450_s4] ss:$0 sm:$0xff]  ;;  %s324_s23 = scalar_lea.vmem %s236_s2, 256  ;;  %p329_p1 = scmp.lt.s32.totalorder %s236_s2, %s236_s2 }
  0x10   :  { %294 = vmatpush3.bf16.msra.mxu1 %v319_v11  ;;  %p325_p0 = scmp.ne.s32.totalorder %s236_s2, %s324_s23  ;;  %p330_p2 = scmp.lt.s32.totalorder %s324_s23, %s324_s23 }
  0x11   :  { %284 = vmatmul.mubr.msk.bf16.vlgmr.msra.gmra.mrb[0].mxu0 %vm64_vm1, %v24_v10  ;;  %295 = vmatprep.subr.bf16.mxu1 %v348_v1 }
  0x12   :  { %p331_p3 = por %p330_p2, %p329_p1 }
  0x14   :  { %296 = vmatpush3.bf16.msra.mxu1 %v320_v12  ;;  %p332_p4 = pnand %p331_p3, %p325_p0 }
  0x15   :  { %297 = vmatprep.subr.bf16.mxu1 %v348_v1 }
  0x18   :  { %298 = vmatpush3.bf16.msra.mxu1 %v321_v13 }
  0x19   :  { %299 = vmatprep.subr.bf16.mxu1 %v348_v1 }
  0x1c   :  { %300 = vmatpush3.bf16.msra.mxu1 %v322_v14 }
  0x1d   :  { %301 = vmatprep.subr.bf16.mxu1 %v348_v1 }
  0x20   :  { %302 = vmatpush3.bf16.msra.mxu1 %v323_v15 }
  0xe4   :  { %v102_v17 = vpop.f32.mrb[0].mxu0 }
  0xe5   :  { %v103_v18 = vadd.f32 %v246_v16, %v102_v17  ;;  %v285_v19 = vpop.f32.mrb[1].mxu0 }
  0xe6   :  { %v105_v20 = vpop.f32.mrb[2].mxu0 }
  0xe7   :  { %v111_v21 = vmul.f32 0.01, %v103_v18  ;;  %v106_v22 = vadd.f32 %v246_v16, %v105_v20  ;;  %v286_v23 = vpop.f32.mrb[3].mxu0  ;;  %vm109_vm2 = vcmp.ge.f32.partialorder %v103_v18, 0.0 }
  0xe9   :  { %vm110_vm3 = vcmp.ge.f32.partialorder %v106_v22, 0.0  ;;  %v112_v24 = vmul.f32 0.01, %v106_v22  ;;  %v113_v25 = vsel %vm109_vm2, %v103_v18, %v111_v21 }
  0xeb   :  { %v114_v26 = vsel %vm110_vm3, %v106_v22, %v112_v24 }
  0xec   :  { %v115_v27 = vpack.c.bf16 %v114_v26, %v113_v25 }
  0xee   :  { %304 = vmatmul.mubr.bf16.vlgmr.msra.gmra.mrb[0].mxu1 %v115_v27 }
 0x1c1   :  { %v221_v29 = vpop.f32.mrb[0].mxu1 }
 0x1c2   :  { %v222_v30 = vadd.f32 %v252_v28, %v221_v29  ;;  %v305_v31 = vpop.f32.mrb[1].mxu1 }
 0x1c3   :  { %v224_v32 = vpop.f32.mrb[2].mxu1 }
 0x1c4   :  { %228 = vst.msk [vmem:[#allocation2] sm:$0xff] %vm64_vm1, %v222_v30  ;;  %v225_v33 = vadd.f32 %v252_v28, %v224_v32  ;;  %v306_v34 = vpop.f32.mrb[3].mxu1 }
 0x1c6   :  { %229 = vst.msk [vmem:[#allocation2 + $0x8] sm:$0xff] %vm64_vm1, %v225_v33 }
 0x1c7   :  { %335 = shalt.err (!%p332_p4)
}
 0x1c8   :  { %s336_s25 = scalar_lea.hbm %s451_s5, 256 }
 0x1c9   :  { %p337_p5 = scmp.ne.s32.totalorder %s451_s5, %s336_s25  ;;  %p340_p6 = scmp.lt.u32.totalorder %s336_s25, %s451_s5 }
 0x1cb   :  { %p342_p7 = pnand %p340_p6, %p337_p5 }
 0x1cd   :  { %345 = shalt.err (!%p342_p7)
}
 0x1ce   :  { %s351_s30 = smov 128   ;;  %s352_s6 = smov 8  }
 0x1cf   :  { %241 = dma.vmem_to_hbm [thread:$0]  %s236_s2, 256, %s451_s5, [#allocation3], %s351_s30, %s351_s30, %s352_s6  }
 0x1d0   :  { %346 = dma.done.wait [#allocation3], 256  }
 0x1d1   :  { %347 = vsyncadd [#allocation3], 4294967040 }
 0x1d2   :  { %245 = vsyncpa [#allocation3], 1 }

</bundles_post_ra>
